<compile_context>
chip_gen: v5e
topology: v5e:2x2
jax: 0.10.0
libtpu: 0.0.40
codegen_flags: <defaults>
</compile_context>

<pallas_src>
import math

import jax
import jax.numpy as jnp
from jax.experimental import pallas as pl
from jax.experimental.pallas import tpu as pltpu


def _round_up(x, m):
    return ((x + m - 1) // m) * m


def _splitter_kernel(x_ref, h_ref, o_ref):
    # x_ref: (B_pad, C)   h_ref: (C, tn)   o_ref: (B_pad, tn)
    o_ref[...] = jnp.dot(
        x_ref[...], h_ref[...], preferred_element_type=jnp.float32
    ).astype(o_ref.dtype)


def _choose_tile_n(C, n_pad):
    """Pick a lane-dense N tile that keeps double-buffered heads within budget."""
    budget = 24 * 1024 * 1024  # bytes for the double-buffered (C, tn) f32 chunk
    max_tn = max(128, budget // (2 * 4 * max(C, 1)))
    tn = min(n_pad, 2048, max_tn)
    if tn >= 256:
        tn = (tn // 256) * 256  # keep MXU passes packed on v6e/v7x
    else:
        tn = 128
    return tn


def splitter_forward(x, heads_flat, num_style_vectors, w_space_dim):
    """x: (B, C) f32, heads_flat: (C, S*W) f32 -> (B, S, W) f32."""
    B, C = x.shape
    Cf, N = heads_flat.shape
    assert Cf == C
    assert N == num_style_vectors * w_space_dim

    # Pad batch to the f32 sublane granule and N to a lane multiple.
    B_pad = _round_up(B, 8)
    N_pad = _round_up(N, 128)
    tn = _choose_tile_n(C, N_pad)
    N_pad = _round_up(N_pad, tn)

    x_p = x if B_pad == B else jnp.pad(x, ((0, B_pad - B), (0, 0)))
    h_p = (
        heads_flat
        if N_pad == N
        else jnp.pad(heads_flat, ((0, 0), (0, N_pad - N)))
    )

    grid = (N_pad // tn,)

    cost = pl.CostEstimate(
        flops=2 * B_pad * C * N_pad,
        transcendentals=0,
        bytes_accessed=4 * (B_pad * C + C * N_pad + B_pad * N_pad),
    )

    out_flat = pl.pallas_call(
        _splitter_kernel,
        out_shape=jax.ShapeDtypeStruct((B_pad, N_pad), x.dtype),
        grid_spec=pltpu.PrefetchScalarGridSpec(
            num_scalar_prefetch=0,
            grid=grid,
            in_specs=[
                # full (padded) activations every step
                pl.BlockSpec((B_pad, C), lambda n: (0, 0)),
                # one lane-dense N chunk of the pre-transposed heads
                pl.BlockSpec((C, tn), lambda n: (0, n)),
            ],
            out_specs=pl.BlockSpec((B_pad, tn), lambda n: (0, n)),
        ),
        compiler_params=pltpu.CompilerParams(
            dimension_semantics=("parallel",),
        ),
        cost_estimate=cost,
    )(x_p, h_p)

    return out_flat[:B, :N].reshape(B, num_style_vectors, w_space_dim)


class Splitter:
    """Deterministic JAX re-implementation of the PyTorch Splitter module."""

    def __init__(self, num_style_vectors, w_space_dim, out_channels, num_ws, key):
        assert not num_ws > 1
        heads = jax.random.normal(
            key, (num_style_vectors, w_space_dim, out_channels), dtype=jnp.float32
        )
        heads = heads / math.sqrt((out_channels + w_space_dim) / 2.0)
        self.num_style_vectors = num_style_vectors
        self.w_space_dim = w_space_dim
        self.heads = heads  # (S, W, C) — kept for reference / state_dict parity
        # One-time pre-transpose + flatten: heads_flat[c, s*W + w] = heads[s, w, c]
        self.heads_flat = jnp.transpose(heads, (2, 0, 1)).reshape(
            out_channels, num_style_vectors * w_space_dim
        )

    def __call__(self, x):
        return splitter_forward(
            x, self.heads_flat, self.num_style_vectors, self.w_space_dim
        )


if __name__ == "__main__":
    # Small shapes consistent with the module's forward:
    #   batch B = 2, out_channels C = 16, num_style_vectors S = 4, w_space_dim W = 32
    B, C, S, W = 2, 16, 4, 32

    key = jax.random.PRNGKey(0)
    k_heads, k_x = jax.random.split(key)

    splitter = Splitter(
        num_style_vectors=S, w_space_dim=W, out_channels=C, num_ws=1, key=k_heads
    )
    x = jax.random.normal(k_x, (B, C), dtype=jnp.float32)

    out = splitter(x)
    out = jax.block_until_ready(out)

    # Reference check (plain JAX einsum matching the PyTorch semantics).
    ref = jnp.einsum("swc,bc->bsw", splitter.heads, x)
    assert out.shape == (B, S, W), out.shape
    assert jnp.allclose(out, ref, atol=1e-5, rtol=1e-5)

    print("KERNEL_OK")
</pallas_src>

<mosaic_0001>
module attributes {stable_mosaic.version = 11 : i64} {
  func.func @_splitter_kernel(%arg0: i32, %arg1: memref<8x16xf32, #tpu.memory_space<vmem>>, %arg2: memref<16x128xf32, #tpu.memory_space<vmem>>, %arg3: memref<8x128xf32, #tpu.memory_space<vmem>>) attributes {dimension_semantics = [#tpu.dimension_semantics<parallel>], iteration_bounds = array<i64: 1>, scalar_prefetch = 0 : i64, scratch_operands = 0 : i64, tpu.core_type = #tpu.core_type<tc>, window_params = [{pipeline_mode = #tpu.pipeline_mode<synchronous>, transform_indices = @transform_0, window_bounds = array<i64: 8, 16>}, {transform_indices = @transform_1, window_bounds = array<i64: 16, 128>}, {transform_indices = @transform_2, window_bounds = array<i64: 8, 128>}]} {
    %c0 = arith.constant 0 : index
    %c0_0 = arith.constant 0 : index
    %0 = vector.load %arg1[%c0, %c0_0] : memref<8x16xf32, #tpu.memory_space<vmem>>, vector<8x16xf32>
    %c0_1 = arith.constant 0 : index
    %c0_2 = arith.constant 0 : index
    %1 = vector.load %arg2[%c0_1, %c0_2] : memref<16x128xf32, #tpu.memory_space<vmem>>, vector<16x128xf32>
    %cst = arith.constant dense<0.000000e+00> : vector<8x128xf32>
    %2 = tpu.matmul %0, %1, %cst {dimension_numbers = #tpu.dot_dimension_numbers<[1], [0], [0], [1], [0, 0, 1, 1], [], []>} : vector<8x16xf32>, vector<16x128xf32>, vector<8x128xf32> -> vector<8x128xf32>
    %c0_3 = arith.constant 0 : index
    %c0_4 = arith.constant 0 : index
    %3 = vector.load %arg3[%c0_3, %c0_4] : memref<8x128xf32, #tpu.memory_space<vmem>>, vector<8x128xf32>
    tpu.vector_store %arg3[%c0_3, %c0_4], %2 {strides = array<i32>} : memref<8x128xf32, #tpu.memory_space<vmem>>, vector<8x128xf32>,
    return
  }
  func.func @transform_0(%arg0: i32) -> (i32, i32) {
    %c0_i32 = arith.constant 0 : i32
    %c0_i32_0 = arith.constant 0 : i32
    %c0_i32_1 = arith.constant 0 : i32
    return %c0_i32, %c0_i32_0 : i32, i32
  }
  func.func @transform_1(%arg0: i32) -> (i32, i32) {
    %c0_i32 = arith.constant 0 : i32
    %c0_i32_0 = arith.constant 0 : i32
    return %c0_i32, %arg0 : i32, i32
  }
  func.func @transform_2(%arg0: i32) -> (i32, i32) {
    %c0_i32 = arith.constant 0 : i32
    %c0_i32_0 = arith.constant 0 : i32
    return %c0_i32, %arg0 : i32, i32
  }
}

</mosaic_0001>

<bundles_post_ra>
// kernel: tpu_custom_call.1
= control target key start
LH: loop header
LB: loop body
LE: loop exit
PB: predicated region body
PF: predicated region fallthrough
CT: control target
= control target key end

     0   :  { %7 = vsyncpa [#allocation3], 0  ;;  %s201_s0 = inlined_call_operand.hbm [shape: f32[8,16], index: 0, kind: input, shape index: {}]   ;;  %s202_s1 = inlined_call_operand.hbm [shape: f32[16,128], index: 1, kind: input, shape index: {}]   ;;  %s203_s2 = inlined_call_operand.hbm [shape: f32[8,128], index: 2, kind: output, shape index: {}]  }
   0x1   :  { %8 = vsyncpa [#allocation6], 0 }
   0x2   :  { %9 = vsyncpa [#allocation4], 0  ;;  %s15_s11 = sshll.u32 %s201_s0, 4  ;;  %s172_s12 = smov [#allocation2]   ;;  %s16_s11 = int_to_ptr.hbm [resolvable:$true] %s15_s11 }
   0x3   :  { %s17_s13 = sshll.u32 %s172_s12, 4  ;;  %s25_s16 = sshll.u32 %s202_s1, 4  ;;  %s18_s13 = int_to_ptr.vmem [resolvable:$true] %s17_s13  ;;  %s26_s16 = int_to_ptr.hbm [resolvable:$true] %s25_s16 }
   0x4   :  { %20 = dma.hbm_to_vmem [thread:$0]  %s16_s11, 128, %s18_s13, [#allocation3]  }
   0x5   :  { %s173_s17 = smov [#allocation5]   ;;  %s174_s19 = smov 128  }
   0x6   :  { %s27_s18 = sshll.u32 %s173_s17, 4  ;;  %s175_s20 = smov 8   ;;  %s28_s18 = int_to_ptr.vmem [resolvable:$true] %s27_s18 }
   0x7   :  { %33 = dma.hbm_to_vmem [thread:$0]  %s26_s16, 256, %s28_s18, [#allocation6], %s174_s19, %s174_s19, %s175_s20  }
   0x8   :  { %166 = dma.done.wait [#allocation3], 128  }
   0x9   :  { %167 = vsyncadd [#allocation3], 4294967168 }
   0xa   :  { %168 = dma.done.wait [#allocation6], 256  }
   0xb   :  { %169 = vsyncadd [#allocation6], 4294967040  ;;  %v44_v0 = vld [vmem:[#allocation5 + $0x8] sm:$0xff]  ;;  %v43_v1 = vld [vmem:[#allocation5] sm:$0xff]  ;;  %vm45_vm0 = vcmask 130048   ;;  %s176_s0 = smov [#allocation7]  }
   0xc   :  { %63 = vmatpush.msra.mxu0 %v44_v0  ;;  %v42_v2 = vld [vmem:[#allocation2] sm:$0xff]  ;;  %s75_s1 = sshll.u32 %s176_s0, 4  ;;  %s77_s23 = sshll.u32 %s203_s2, 4  ;;  %s76_s1 = int_to_ptr.vmem [resolvable:$true] %s75_s1  ;;  %s78_s23 = int_to_ptr.hbm [resolvable:$true] %s77_s23 }
   0xe   :  { %64 = vmatpush.msra.mxu0 %v43_v1 }
   0xf   :  { %88 = vmatmul.msk.f32.vlgmr.msra.gmra.mxu0 %vm45_vm0, %v42_v2 }
  0x8c   :  { %v66_v3 = vpop.f32.mrf.mxu0 }
  0x8d   :  { %69 = vst [vmem:[#allocation7] sm:$0xff] %v66_v3 }
  0x8e   :  { %80 = dma.vmem_to_hbm [thread:$0]  %s76_s1, 128, %s78_s23, [#allocation4]  }
  0x8f   :  { %170 = dma.done.wait [#allocation4], 128  }
  0x90   :  { %171 = vsyncadd [#allocation4], 4294967168 }
  0x91   :  { %85 = vsyncpa [#allocation3], 1 }
  0x92   :  { %86 = vsyncpa [#allocation6], 1 }
  0x93   :  { %87 = vsyncpa [#allocation4], 1 }

</bundles_post_ra>
